<compile_context>
chip_gen: v7x
topology: tpu7x:2x2x1
jax: 0.10.0
libtpu: 0.0.40
codegen_flags: <defaults>
</compile_context>

<pallas_src>
import jax
import jax.numpy as jnp
import numpy as np
from jax.experimental import pallas as pl
from jax.experimental.pallas import tpu as pltpu


def _round_up(v, m):
    return ((v + m - 1) // m) * m


def _pick_group_batch(n, s, d, b, x_itemsize, *,
                      target_hbm_bytes=2 << 20,     # ~1 MB v5e / 2 MB v6e / 4 MB v7x
                      max_tile_vmem_bytes=8 << 20,  # per-buffer cap (v7x: 64 MiB total)
                      min_grid_steps=8):            # keep both v7x TensorCores fed
    """Groups per grid step, in priority order:
      * G divides n and the output lane axis is dense (G % 128 == 0 or G == n).
      * lane-padded VMEM footprint of one x buffer <= max_tile_vmem_bytes.
      * per-step HBM bytes of x >= target_hbm_bytes when possible.
      * keep >= min_grid_steps grid steps (v7x megacore) unless that would
        shrink the tile below ~target/4.
    """
    lane_d = _round_up(max(d, 1), 128)   # VMEM lane padding of the feature dim
    cands = [g for g in range(1, n + 1)
             if n % g == 0 and (g % 128 == 0 or g == n)]   # always contains n

    def hbm_bytes(g):
        return g * s * d * x_itemsize

    def vmem_bytes(g):
        return g * s * lane_d * x_itemsize

    def steps(g):
        return b * (n // g)

    fit = [g for g in cands if vmem_bytes(g) <= max_tile_vmem_bytes]
    if not fit:                      # even the smallest legal G is huge; keep shape rules
        fit = cands[:1]
    big = [g for g in fit if hbm_bytes(g) >= target_hbm_bytes]
    g = big[0] if big else fit[-1]   # smallest G meeting the byte target, else largest
    if steps(g) < min_grid_steps:
        for g2 in reversed([c for c in fit if c < g]):
            if steps(g2) >= min_grid_steps and hbm_bytes(g2) >= target_hbm_bytes // 4:
                g = g2
                break
    return g


def _pick_chunk_groups(G, s, *, target_rows=512):
    """Largest divisor of G whose row count (chunk_g * s) stays near target_rows."""
    cap = max(1, target_rows // max(1, s))
    best = 1
    for g in range(1, min(G, cap) + 1):
        if G % g == 0:
            best = g
    return best


def _make_kernel(C, s, chunk_g, num_chunks):
    chunk_rows = chunk_g * s

    def kernel(x_ref, w1t_ref, w2t_ref, shifts_ref, o_ref, pool_ref):
        # x_ref:      (1, G*s, d)  input dtype, features on the lane axis
        # w1t_ref:    (d, C)  bf16 conv1 weight^T with bn1 scale folded in
        # w2t_ref:    (C, C)  bf16 conv2 weight^T with bn2 scale folded in
        # shifts_ref: (2, C)  f32  row 0: bn1 shift, row 1: bn2 shift
        # o_ref:      (1, C, G)    pooled output block, groups on the lane axis
        # pool_ref:   (G, C)  f32  VMEM scratch accumulating per-group maxima
        w1 = w1t_ref[...]
        w2 = w2t_ref[...]
        # Hoist shift loads + broadcasts out of the chunk loop (JAX does not
        # CSE broadcast_in_dim).
        sh1 = jnp.broadcast_to(shifts_ref[0:1, :], (chunk_rows, C))
        sh2 = jnp.broadcast_to(shifts_ref[1:2, :], (chunk_rows, C))

        def process_chunk(i):
            r0 = i * chunk_rows
            g0 = i * chunk_g
            if num_chunks > 1:
                r0 = pl.multiple_of(r0, chunk_rows)
                g0 = pl.multiple_of(g0, chunk_g)
            xc = x_ref[0, pl.ds(r0, chunk_rows), :].astype(jnp.bfloat16)
            h = jnp.dot(xc, w1, preferred_element_type=jnp.float32)
            h = jnp.maximum(h + sh1, 0.0)                        # bn1 shift + relu
            h = jnp.dot(h.astype(jnp.bfloat16), w2,
                        preferred_element_type=jnp.float32)
            h = jnp.maximum(h + sh2, 0.0)                        # bn2 shift + relu
            pooled = jnp.max(h.reshape(chunk_g, s, C), axis=1)   # max over s
            pool_ref[pl.ds(g0, chunk_g), :] = pooled             # sublane store

        if num_chunks == 1:
            process_chunk(0)
        else:
            def body(i, carry):
                process_chunk(i)
                return carry
            jax.lax.fori_loop(0, num_chunks, body, 0, unroll=(num_chunks <= 8))

        # Single lane-dense store of the whole (C, G) block; the small transpose
        # lands on the otherwise-idle XLU.
        o_ref[0] = pool_ref[...].T.astype(o_ref.dtype)

    return kernel


def local_op_pallas(x, w1, w2, bn1, bn2, eps=1e-5, *,
                    out_dtype=jnp.float32,
                    target_tile_bytes=2 << 20,
                    x_buffer_count=2):
    """x: (b, n, s, d).  w1: (C, d), w2: (C, C).  bn*: (gamma, beta, mean, var).

    Returns (b, C, n), matching Local_op.forward (eval-mode BatchNorm).
    out_dtype=jnp.bfloat16 halves the output writeback if the consumer accepts
    bf16.  x_buffer_count=3 enables pl.Buffered(3) on the x input if a profile
    still shows exposed input DMA.
    """
    b, n, s, d = x.shape
    C = w1.shape[0]

    # Fold eval-mode BatchNorm into the conv weights (scale) + per-channel shift.
    g1, be1, m1, v1 = bn1
    g2, be2, m2, v2 = bn2
    scale1 = g1 / jnp.sqrt(v1 + eps)
    shift1 = be1 - m1 * scale1
    scale2 = g2 / jnp.sqrt(v2 + eps)
    shift2 = be2 - m2 * scale2

    w1t = (w1.astype(jnp.float32).T * scale1[None, :]).astype(jnp.bfloat16)  # (d, C)
    w2t = (w2.astype(jnp.float32).T * scale2[None, :]).astype(jnp.bfloat16)  # (C, C)
    shifts = jnp.stack([shift1, shift2], axis=0).astype(jnp.float32)         # (2, C)

    # (b, n, s, d) -> (b, n*s, d): free reshape of a contiguous array; keep the
    # original dtype and cast to bf16 inside the kernel (no extra HBM pass).
    xg = x.reshape(b, n * s, d)
    x_itemsize = xg.dtype.itemsize

    G = _pick_group_batch(n, s, d, b, x_itemsize,
                          target_hbm_bytes=target_tile_bytes)
    chunk_g = _pick_chunk_groups(G, s)
    num_chunks = G // chunk_g
    grid = (b, n // G)

    # --- explicit VMEM budget (v5e scoped default 16 MiB; v7x 64 MiB physical) ---
    lane_d = _round_up(d, 128)
    lane_C = _round_up(C, 128)
    lane_G = _round_up(G, 128)
    out_itemsize = jnp.dtype(out_dtype).itemsize
    x_tile = G * s * lane_d * x_itemsize
    out_tile = _round_up(C, 8) * lane_G * out_itemsize
    w_tiles = (_round_up(d, 16) * lane_C + _round_up(C, 16) * lane_C) * 2
    shift_tile = 8 * lane_C * 4
    pool_scratch = _round_up(G, 8) * lane_C * 4
    interm = 8 * chunk_g * s * lane_C * 4      # live f32 temporaries in the chunk loop
    total_vmem = (x_tile * x_buffer_count + out_tile * 2
                  + (w_tiles + shift_tile) * 2 + pool_scratch + interm)
    vmem_limit = int(min(max(total_vmem * 2, 16 << 20), 60 << 20))

    flops = 2 * b * n * s * (d * C + C * C)
    bytes_accessed = (xg.size * x_itemsize + w1t.size * 2 + w2t.size * 2
                      + shifts.size * 4 + b * C * n * out_itemsize)

    x_spec_kwargs = {}
    if x_buffer_count != 2:
        x_spec_kwargs["pipeline_mode"] = pl.Buffered(x_buffer_count)
    x_spec = pl.BlockSpec((1, G * s, d), lambda bi, ni: (bi, ni, 0),
                          **x_spec_kwargs)

    kernel = _make_kernel(C, s, chunk_g, num_chunks)

    out = pl.pallas_call(
        kernel,
        out_shape=jax.ShapeDtypeStruct((b, C, n), out_dtype),
        grid_spec=pltpu.PrefetchScalarGridSpec(
            num_scalar_prefetch=0,
            grid=grid,
            in_specs=[
                x_spec,                                       # x slab
                pl.BlockSpec((d, C), lambda bi, ni: (0, 0)),  # W1^T * scale1 (resident)
                pl.BlockSpec((C, C), lambda bi, ni: (0, 0)),  # W2^T * scale2 (resident)
                pl.BlockSpec((2, C), lambda bi, ni: (0, 0)),  # bn shifts
            ],
            out_specs=pl.BlockSpec((1, C, G), lambda bi, ni: (bi, 0, ni)),
            scratch_shapes=[pltpu.VMEM((G, C), jnp.float32)],
        ),
        compiler_params=pltpu.CompilerParams(
            dimension_semantics=("parallel", "parallel"),
            vmem_limit_bytes=vmem_limit),
        cost_estimate=pl.CostEstimate(
            flops=int(flops), transcendentals=0,
            bytes_accessed=int(bytes_accessed)),
    )(xg, w1t, w2t, shifts)

    return out  # already (b, C, n) -- no wrapper transpose needed


def local_op_reference(x, w1, w2, bn1, bn2, eps=1e-5):
    """Pure-JAX f32 reference implementing the same eval-mode semantics."""
    b, n, s, d = x.shape
    g1, be1, m1, v1 = bn1
    g2, be2, m2, v2 = bn2
    xg = x.reshape(b * n, s, d).astype(jnp.float32)
    h = jnp.einsum("gsd,cd->gsc", xg, w1.astype(jnp.float32))
    h = (h - m1) / jnp.sqrt(v1 + eps) * g1 + be1
    h = jnp.maximum(h, 0.0)
    h = jnp.einsum("gsc,kc->gsk", h, w2.astype(jnp.float32))
    h = (h - m2) / jnp.sqrt(v2 + eps) * g2 + be2
    h = jnp.maximum(h, 0.0)
    out = jnp.max(h, axis=1)                        # (b*n, C)
    return out.reshape(b, n, -1).transpose(0, 2, 1)  # (b, C, n)


def _make_inputs(key, b, n, s, d, C):
    kx, kw1, kw2, kg1, kb1, kg2, kb2 = jax.random.split(key, 7)
    x = jax.random.normal(kx, (b, n, s, d), dtype=jnp.float32)
    # Conv1d(kernel_size=1, bias=False) weights: (out_channels, in_channels)
    w1 = jax.random.normal(kw1, (C, d), dtype=jnp.float32) * 0.1
    w2 = jax.random.normal(kw2, (C, C), dtype=jnp.float32) * 0.1
    bn1 = (1.0 + 0.1 * jax.random.normal(kg1, (C,), dtype=jnp.float32),   # gamma
           0.1 * jax.random.normal(kb1, (C,), dtype=jnp.float32),         # beta
           jnp.linspace(-0.2, 0.2, C, dtype=jnp.float32),                 # running_mean
           jnp.linspace(0.5, 1.5, C, dtype=jnp.float32))                  # running_var
    bn2 = (1.0 + 0.1 * jax.random.normal(kg2, (C,), dtype=jnp.float32),
           0.1 * jax.random.normal(kb2, (C,), dtype=jnp.float32),
           jnp.linspace(0.1, -0.1, C, dtype=jnp.float32),
           jnp.linspace(0.8, 1.2, C, dtype=jnp.float32))
    return x, w1, w2, bn1, bn2


if __name__ == "__main__":
    key = jax.random.PRNGKey(0)
    k1, k2 = jax.random.split(key)

    # Case 1: small shapes consistent with the module (in_channels=d=16,
    # out_channels=C=32); single-chunk path, output block covers full n.
    b, n, s, d, C = 2, 8, 16, 16, 32
    x, w1, w2, bn1, bn2 = _make_inputs(k1, b, n, s, d, C)
    out = jax.block_until_ready(local_op_pallas(x, w1, w2, bn1, bn2))
    ref = jax.block_until_ready(local_op_reference(x, w1, w2, bn1, bn2))
    assert out.shape == (b, C, n), f"bad output shape {out.shape}"
    # bf16 MXU operands vs f32 reference -> relaxed tolerance.
    np.testing.assert_allclose(np.asarray(out), np.asarray(ref), rtol=2e-2, atol=2e-2)

    # Case 2: larger n exercises the lane-dense (multiple-of-128) output block
    # and the in-kernel fori_loop chunking path.
    b, n, s, d, C = 1, 256, 16, 16, 32
    x, w1, w2, bn1, bn2 = _make_inputs(k2, b, n, s, d, C)
    out = jax.block_until_ready(local_op_pallas(x, w1, w2, bn1, bn2))
    ref = jax.block_until_ready(local_op_reference(x, w1, w2, bn1, bn2))
    assert out.shape == (b, C, n), f"bad output shape {out.shape}"
    np.testing.assert_allclose(np.asarray(out), np.asarray(ref), rtol=2e-2, atol=2e-2)

    print("KERNEL_OK")
</pallas_src>

<mosaic_0001>
module attributes {stable_mosaic.version = 11 : i64} {
  func.func @kernel(%arg0: i32, %arg1: i32, %arg2: memref<1x128x16xf32, #tpu.memory_space<vmem>>, %arg3: memref<16x32xbf16, #tpu.memory_space<vmem>>, %arg4: memref<32x32xbf16, #tpu.memory_space<vmem>>, %arg5: memref<2x32xf32, #tpu.memory_space<vmem>>, %arg6: memref<1x32x8xf32, #tpu.memory_space<vmem>>, %arg7: memref<8x32xf32, #tpu.memory_space<vmem>>) attributes {dimension_semantics = [#tpu.dimension_semantics<parallel>, #tpu.dimension_semantics<parallel>], iteration_bounds = array<i64: 2, 1>, scalar_prefetch = 0 : i64, scratch_operands = 1 : i64, tpu.core_type = #tpu.core_type<tc>, window_params = [{transform_indices = @transform_0, window_bounds = array<i64: 1, 128, 16>}, {pipeline_mode = #tpu.pipeline_mode<synchronous>, transform_indices = @transform_1, window_bounds = array<i64: 16, 32>}, {pipeline_mode = #tpu.pipeline_mode<synchronous>, transform_indices = @transform_2, window_bounds = array<i64: 32, 32>}, {pipeline_mode = #tpu.pipeline_mode<synchronous>, transform_indices = @transform_3, window_bounds = array<i64: 2, 32>}, {transform_indices = @transform_4, window_bounds = array<i64: 1, 32, 8>}]} {
    %c0 = arith.constant 0 : index
    %c0_0 = arith.constant 0 : index
    %0 = vector.load %arg3[%c0, %c0_0] : memref<16x32xbf16, #tpu.memory_space<vmem>>, vector<16x32xbf16>
    %c0_1 = arith.constant 0 : index
    %c0_2 = arith.constant 0 : index
    %1 = vector.load %arg4[%c0_1, %c0_2] : memref<32x32xbf16, #tpu.memory_space<vmem>>, vector<32x32xbf16>
    %c0_3 = arith.constant 0 : index
    %c0_4 = arith.constant 0 : index
    %2 = vector.load %arg5[%c0_3, %c0_4] : memref<2x32xf32, #tpu.memory_space<vmem>>, vector<1x32xf32>
    %3 = vector.shape_cast %2 : vector<1x32xf32> to vector<1x32xf32>
    %4 = vector.broadcast %3 : vector<1x32xf32> to vector<128x32xf32>
    %c1 = arith.constant 1 : index
    %c0_5 = arith.constant 0 : index
    %5 = vector.load %arg5[%c1, %c0_5] : memref<2x32xf32, #tpu.memory_space<vmem>>, vector<1x32xf32>
    %6 = vector.shape_cast %5 : vector<1x32xf32> to vector<1x32xf32>
    %7 = vector.broadcast %6 : vector<1x32xf32> to vector<128x32xf32>
    %c0_6 = arith.constant 0 : index
    %c0_7 = arith.constant 0 : index
    %c0_8 = arith.constant 0 : index
    %8 = vector.load %arg2[%c0_6, %c0_7, %c0_8] : memref<1x128x16xf32, #tpu.memory_space<vmem>>, vector<1x128x16xf32>
    %9 = vector.shape_cast %8 : vector<1x128x16xf32> to vector<128x16xf32>
    %10 = arith.truncf %9 : vector<128x16xf32> to vector<128x16xbf16>
    %cst = arith.constant dense<0.000000e+00> : vector<128x32xf32>
    %11 = tpu.matmul %10, %0, %cst {dimension_numbers = #tpu.dot_dimension_numbers<[1], [0], [0], [1], [0, 0, 1, 1], [], []>} : vector<128x16xbf16>, vector<16x32xbf16>, vector<128x32xf32> -> vector<128x32xf32>
    %12 = arith.addf %11, %4 : vector<128x32xf32>
    %cst_9 = arith.constant 0.000000e+00 : f32
    %13 = vector.broadcast %cst_9 : f32 to vector<128x32xf32>
    %14 = arith.maximumf %12, %13 : vector<128x32xf32>
    %15 = arith.truncf %14 : vector<128x32xf32> to vector<128x32xbf16>
    %cst_10 = arith.constant dense<0.000000e+00> : vector<128x32xf32>
    %16 = tpu.matmul %15, %1, %cst_10 {dimension_numbers = #tpu.dot_dimension_numbers<[1], [0], [0], [1], [0, 0, 1, 1], [], []>} : vector<128x32xbf16>, vector<32x32xbf16>, vector<128x32xf32> -> vector<128x32xf32>
    %17 = arith.addf %16, %7 : vector<128x32xf32>
    %cst_11 = arith.constant 0.000000e+00 : f32
    %18 = vector.broadcast %cst_11 : f32 to vector<128x32xf32>
    %19 = arith.maximumf %17, %18 : vector<128x32xf32>
    %20 = vector.shape_cast %19 : vector<128x32xf32> to vector<8x16x32xf32>
    %cst_12 = arith.constant dense<0xFF800000> : vector<8x32xf32>
    %21 = vector.multi_reduction <maximumf>, %20, %cst_12 [1] : vector<8x16x32xf32> to vector<8x32xf32>
    %c0_13 = arith.constant 0 : index
    %c0_14 = arith.constant 0 : index
    %22 = vector.load %arg7[%c0_13, %c0_14] : memref<8x32xf32, #tpu.memory_space<vmem>>, vector<8x32xf32>
    tpu.vector_store %arg7[%c0_13, %c0_14], %21 {strides = array<i32>} : memref<8x32xf32, #tpu.memory_space<vmem>>, vector<8x32xf32>,
    %c0_15 = arith.constant 0 : index
    %c0_16 = arith.constant 0 : index
    %23 = vector.load %arg7[%c0_15, %c0_16] : memref<8x32xf32, #tpu.memory_space<vmem>>, vector<8x32xf32>
    %24 = tpu.transpose %23, [1, 0] : vector<8x32xf32> -> vector<32x8xf32>
    %c0_17 = arith.constant 0 : index
    %c0_18 = arith.constant 0 : index
    %c0_19 = arith.constant 0 : index
    %25 = vector.load %arg6[%c0_17, %c0_18, %c0_19] : memref<1x32x8xf32, #tpu.memory_space<vmem>>, vector<1x32x8xf32>
    %26 = vector.shape_cast %25 : vector<1x32x8xf32> to vector<32x8xf32>
    %27 = vector.shape_cast %24 : vector<32x8xf32> to vector<1x32x8xf32>
    tpu.vector_store %arg6[%c0_17, %c0_18, %c0_19], %27 {strides = array<i32>} : memref<1x32x8xf32, #tpu.memory_space<vmem>>, vector<1x32x8xf32>,
    return
  }
  func.func @transform_0(%arg0: i32, %arg1: i32) -> (i32, i32, i32) {
    %c0_i32 = arith.constant 0 : i32
    %c0_i32_0 = arith.constant 0 : i32
    return %arg0, %arg1, %c0_i32 : i32, i32, i32
  }
  func.func @transform_1(%arg0: i32, %arg1: i32) -> (i32, i32) {
    %c0_i32 = arith.constant 0 : i32
    %c0_i32_0 = arith.constant 0 : i32
    %c0_i32_1 = arith.constant 0 : i32
    return %c0_i32, %c0_i32_0 : i32, i32
  }
  func.func @transform_2(%arg0: i32, %arg1: i32) -> (i32, i32) {
    %c0_i32 = arith.constant 0 : i32
    %c0_i32_0 = arith.constant 0 : i32
    %c0_i32_1 = arith.constant 0 : i32
    return %c0_i32, %c0_i32_0 : i32, i32
  }
  func.func @transform_3(%arg0: i32, %arg1: i32) -> (i32, i32) {
    %c0_i32 = arith.constant 0 : i32
    %c0_i32_0 = arith.constant 0 : i32
    %c0_i32_1 = arith.constant 0 : i32
    return %c0_i32, %c0_i32_0 : i32, i32
  }
  func.func @transform_4(%arg0: i32, %arg1: i32) -> (i32, i32, i32) {
    %c0_i32 = arith.constant 0 : i32
    %c0_i32_0 = arith.constant 0 : i32
    return %arg0, %c0_i32, %arg1 : i32, i32, i32
  }
}

</mosaic_0001>

<bundles_post_ra>
// kernel: tpu_custom_call.1
= control target key start
LH: loop header
LB: loop body
LE: loop exit
PB: predicated region body
PF: predicated region fallthrough
CT: control target
= control target key end

     0   :  { %s962_s15 = smov 0   ;;  %s964_s16 = smov 0   ;;  %s1084_s0 = inlined_call_operand.vmem [shape: f32[2,128,16], index: 0, kind: input, shape index: {}]   ;;  %s1085_s1 = inlined_call_operand.vmem [shape: bf16[16,32], index: 1, kind: input, shape index: {}]   ;;  %s1086_s2 = inlined_call_operand.vmem [shape: bf16[32,32], index: 2, kind: input, shape index: {}]   ;;  %s1087_s3 = inlined_call_operand.vmem [shape: f32[2,32], index: 3, kind: input, shape index: {}]   ;;  %s1088_s4 = inlined_call_operand.vmem [shape: f32[2,32,8], index: 4, kind: output, shape index: {}]  }
   0x1   :  { %s966_s17 = smov 0  }
   0x2 LB: > { %s26_s18 = sadd.s32 1, %s931_s16  ;;  %p798_p0 = scmp.ge.s32.totalorder %s935_s17, 1  ;;  %s935_s17 = sphi %s966_s17, %s14_s17   ;;  %s931_s16 = sphi %s964_s16, %s1090_s16   ;;  %s927_s15 = sphi %s962_s15, %s1089_s15  }
   0x3   : > { %p28_p1 = scmp.ge.s32.totalorder %s26_s18, 2  ;;  %p183_p2 = scmp.lt.s32.totalorder %s935_s17, 3 }
   0x5   : > { %s1092_s18 = smov (%p28_p1, %s26_s18), 0  ;;  %p184_p3 = pnand %p798_p0, %p183_p2 }
   0x6   : > { %v910_v0 = vld [vmem:[%s1085_s1] sm:$0xff] (!%p184_p3)   ;;  %p217_p4 = scmp.lt.s32.totalorder (!%p184_p3), %s927_s15, 1  ;;  %vm281_vm0 = vcmask (!%p184_p3), 130048   ;;  %v912_v26 = vld [vmem:[%s1086_s2 + $0x8] sm:$0xff] (!%p184_p3)   ;;  %vm439_vm1 = vcmask (!%p184_p3), 261120   ;;  %vm657_vm2 = vcmask (!%p184_p3), 1041409  }
   0x7   : > { %187 = sbr.rel (%p184_p3) target bundleno = 653 (0x28d), region = 36  ;;  %847 = vmatprep.subr.bf16.mxu0 (!%p184_p3), %v910_v0  ;;  %v911_v25 = vld [vmem:[%s1086_s2] sm:$0xff] (!%p184_p3)   ;;  %vm659_vm3 = vcmask (!%p184_p3), 1042434   ;;  %vm661_vm4 = vcmask (!%p184_p3), 1043459   ;;  %vm663_vm5 = vcmask (!%p184_p3), 1044484   ;;  %vm665_vm6 = vcmask (!%p184_p3), 1045509  }
   0x8   : > { %848 = vmatpush3.bf16.msra.mxu0 (!%p184_p3), %v910_v0  ;;  %865 = vmatprep.subr.bf16.mxu1 (!%p184_p3), %v911_v25  ;;  %v803_v27 = vld [vmem:[%s1087_s3] ss:$0 sm:$0xff] (!%p184_p3)  ;;  %vm667_vm7 = vcmask (!%p184_p3), 1046534   ;;  %vm669_vm8 = vcmask (!%p184_p3), 1047559   ;;  %vm706_vm9 = vcmask (!%p184_p3), 64512  }
   0x9   : > { %866 = vmatpush3.bf16.msra.mxu1 (!%p184_p3), %v911_v25 }
   0xa   : > { %867 = vmatprep.subr.bf16.mxu1 (!%p184_p3), %v912_v26 }
   0xd   : > { %868 = vmatpush3.bf16.msra.mxu1 (!%p184_p3), %v912_v26 }
   0xe   : > { %s1094_s15 = smov (!%p217_p4, %s927_s15), 1 }
   0xf   : > { %s826_s21 = sshll.u32 %s1094_s15, 7  ;;  %s827_s7 = sshll.u32 %s1094_s15, 5 }
  0x10   : > { %s989_s24 = scalar_lea.vmem %s1084_s0, %s826_s21  ;;  %s233_s10 = scalar_lea.vmem %s1088_s4, %s827_s7 }
  0x11   : > { %v251_v1 = vld [vmem:[%s989_s24] sm:$0xff]  ;;  %v252_v2 = vld [vmem:[%s989_s24 + $0x8] sm:$0xff]  ;;  %v253_v3 = vld [vmem:[%s989_s24 + $0x10] sm:$0xff] }
  0x12   : > { %v267_v4 = vpack.c.bf16 %v252_v2, %v251_v1  ;;  %v254_v5 = vld [vmem:[%s989_s24 + $0x18] sm:$0xff]  ;;  %v255_v6 = vld [vmem:[%s989_s24 + $0x20] sm:$0xff]  ;;  %v256_v7 = vld [vmem:[%s989_s24 + $0x28] sm:$0xff] }
  0x13   : > { %v268_v8 = vpack.c.bf16 %v254_v5, %v253_v3  ;;  %v269_v9 = vpack.c.bf16 %v256_v7, %v255_v6  ;;  %v257_v10 = vld [vmem:[%s989_s24 + $0x30] sm:$0xff]  ;;  %v258_v11 = vld [vmem:[%s989_s24 + $0x38] sm:$0xff]  ;;  %v259_v12 = vld [vmem:[%s989_s24 + $0x40] sm:$0xff] }
  0x14   : > { %849 = vmatprep.mubr.msk.bf16.mxu0 %vm281_vm0, %v267_v4  ;;  %v260_v13 = vld [vmem:[%s989_s24 + $0x48] sm:$0xff]  ;;  %v270_v14 = vpack.c.bf16 %v258_v11, %v257_v10  ;;  %v261_v16 = vld [vmem:[%s989_s24 + $0x50] sm:$0xff]  ;;  %v262_v17 = vld [vmem:[%s989_s24 + $0x58] sm:$0xff] }
  0x15   : > { %850 = vmatmul.mubr.msk.bf16.vlgmr.msra.gmra.mrb[0].mxu0 %vm281_vm0, %v268_v8  ;;  %v271_v15 = vpack.c.bf16 %v260_v13, %v259_v12  ;;  %v263_v18 = vld [vmem:[%s989_s24 + $0x60] sm:$0xff]  ;;  %v264_v19 = vld [vmem:[%s989_s24 + $0x68] sm:$0xff]  ;;  %v272_v20 = vpack.c.bf16 %v262_v17, %v261_v16  ;;  %v265_v22 = vld [vmem:[%s989_s24 + $0x70] sm:$0xff] }
  0x16   : > { %853 = vmatprep.mubr.msk.bf16.mxu0 %vm281_vm0, %v269_v9  ;;  %v273_v21 = vpack.c.bf16 %v264_v19, %v263_v18  ;;  %v266_v23 = vld [vmem:[%s989_s24 + $0x78] sm:$0xff] }
  0x17   : > { %v274_v24 = vpack.c.bf16 %v266_v23, %v265_v22 }
  0x1d   : > { %854 = vmatmul.mubr.msk.bf16.gmra.mrb[4].mxu0 %vm281_vm0, %v270_v14 }
  0x1e   : > { %857 = vmatprep.mubr.msk.bf16.mxu0 %vm281_vm0, %v271_v15 }
  0x25   : > { %858 = vmatmul.mubr.msk.bf16.gmra.mrb[8].mxu0 %vm281_vm0, %v272_v20  ;;  %v1035_v20 = vld [vmem:[%s1087_s3 + $0x1] ss:$0 sm:$0xff] }
  0x26   : > { %861 = vmatprep.mubr.msk.bf16.mxu0 %vm281_vm0, %v273_v21 }
  0x2d   : > { %862 = vmatmul.mubr.msk.bf16.gmra.mrb[12].mxu0 %vm281_vm0, %v274_v24 }
  0xe8   : > { %v851_v28 = vpop.f32.mrb[0].mxu0 }
  0xe9   : > { %v349_v29 = vadd.f32 %v851_v28, %v803_v27  ;;  %v340_v30 = vpop.f32.mrb[1].mxu0 }
  0xea   : > { %v341_v31 = vadd.f32 %v803_v27, %v340_v30  ;;  %v852_v32 = vpop.f32.mrb[2].mxu0 }
  0xeb   : > { %v352_v33 = vadd.f32 %v852_v32, %v803_v27  ;;  %v343_v34 = vpop.f32.mrb[3].mxu0  ;;  %v405_v36 = vmax.f32 %v349_v29, 0.0 }
  0xec   : > { %v344_v35 = vadd.f32 %v803_v27, %v343_v34  ;;  %v403_v38 = vmax.f32 %v341_v31, 0.0 }
  0xed   : > { %v406_v37 = vmax.f32 %v352_v33, 0.0 }
  0xee   : > { %v404_v39 = vmax.f32 %v344_v35, 0.0 }
  0xef   : > { %v420_v40 = vpack.c.bf16 %v406_v37, %v405_v36 }
  0xf0   : > { %v855_v41 = vpop.f32.mrb[4].mxu0  ;;  %v419_v42 = vpack.c.bf16 %v404_v39, %v403_v38 }
  0xf1   : > { %v365_v43 = vadd.f32 %v855_v41, %v803_v27  ;;  %v356_v44 = vpop.f32.mrb[5].mxu0 }
  0xf2   : > { %v357_v45 = vadd.f32 %v803_v27, %v356_v44  ;;  %v856_v46 = vpop.f32.mrb[6].mxu0  ;;  %869 = vmatprep.mubr.msk.bf16.mxu1 %vm439_vm1, %v419_v42 }
  0xf3   : > { %v368_v47 = vadd.f32 %v856_v46, %v803_v27  ;;  %v359_v48 = vpop.f32.mrb[7].mxu0  ;;  %870 = vmatmul.mubr.msk.bf16.vlgmr.msra.gmra.mrb[0].mxu1 %vm439_vm1, %v420_v40  ;;  %v409_v50 = vmax.f32 %v365_v43, 0.0 }
  0xf4   : > { %v360_v49 = vadd.f32 %v803_v27, %v359_v48  ;;  %v407_v52 = vmax.f32 %v357_v45, 0.0 }
  0xf5   : > { %v410_v51 = vmax.f32 %v368_v47, 0.0 }
  0xf6   : > { %v408_v53 = vmax.f32 %v360_v49, 0.0 }
  0xf7   : > { %v422_v54 = vpack.c.bf16 %v410_v51, %v409_v50 }
  0xf8   : > { %v421_v55 = vpack.c.bf16 %v408_v53, %v407_v52  ;;  %v859_v56 = vpop.f32.mrb[8].mxu0 }
  0xf9   : > { %v381_v57 = vadd.f32 %v859_v56, %v803_v27  ;;  %v372_v58 = vpop.f32.mrb[9].mxu0 }
  0xfa   : > { %v373_v59 = vadd.f32 %v803_v27, %v372_v58  ;;  %v860_v60 = vpop.f32.mrb[10].mxu0  ;;  %873 = vmatprep.mubr.msk.bf16.mxu1 %vm439_vm1, %v421_v55 }
  0xfb   : > { %v384_v61 = vadd.f32 %v860_v60, %v803_v27  ;;  %v375_v62 = vpop.f32.mrb[11].mxu0  ;;  %874 = vmatmul.mubr.msk.bf16.gmra.mrb[4].mxu1 %vm439_vm1, %v422_v54  ;;  %v413_v0 = vmax.f32 %v381_v57, 0.0 }
  0xfc   : > { %v376_v63 = vadd.f32 %v803_v27, %v375_v62  ;;  %v411_v2 = vmax.f32 %v373_v59, 0.0 }
  0xfd   : > { %v414_v1 = vmax.f32 %v384_v61, 0.0 }
  0xfe   : > { %v412_v3 = vmax.f32 %v376_v63, 0.0 }
  0xff   : > { %v424_v4 = vpack.c.bf16 %v414_v1, %v413_v0 }
 0x100   : > { %v423_v5 = vpack.c.bf16 %v412_v3, %v411_v2  ;;  %v863_v6 = vpop.f32.mrb[12].mxu0 }
 0x101   : > { %v397_v7 = vadd.f32 %v863_v6, %v803_v27  ;;  %v388_v8 = vpop.f32.mrb[13].mxu0 }
 0x102   : > { %v389_v9 = vadd.f32 %v803_v27, %v388_v8  ;;  %v864_v10 = vpop.f32.mrb[14].mxu0  ;;  %877 = vmatprep.mubr.msk.bf16.mxu1 %vm439_vm1, %v423_v5 }
 0x103   : > { %v400_v11 = vadd.f32 %v864_v10, %v803_v27  ;;  %v391_v12 = vpop.f32.mrb[15].mxu0  ;;  %878 = vmatmul.mubr.msk.bf16.gmra.mrb[8].mxu1 %vm439_vm1, %v424_v4  ;;  %v417_v14 = vmax.f32 %v397_v7, 0.0 }
 0x104   : > { %v392_v13 = vadd.f32 %v803_v27, %v391_v12  ;;  %v415_v16 = vmax.f32 %v389_v9, 0.0 }
 0x105   : > { %v418_v15 = vmax.f32 %v400_v11, 0.0 }
 0x106   : > { %v416_v17 = vmax.f32 %v392_v13, 0.0 }
 0x107   : > { %v426_v18 = vpack.c.bf16 %v418_v15, %v417_v14 }
 0x108   : > { %v425_v19 = vpack.c.bf16 %v416_v17, %v415_v16 }
 0x10a   : > { %881 = vmatprep.mubr.msk.bf16.mxu1 %vm439_vm1, %v425_v19 }
 0x10b   : > { %882 = vmatmul.mubr.msk.bf16.gmra.mrb[12].mxu1 %vm439_vm1, %v426_v18 }
 0x1c6   : > { %v871_v21 = vpop.f32.mrb[0].mxu1 }
 0x1c7   : > { %v507_v22 = vadd.f32 %v871_v21, %v1035_v20  ;;  %v498_v23 = vpop.f32.mrb[1].mxu1 }
 0x1c8   : > { %v499_v24 = vadd.f32 %v1035_v20, %v498_v23  ;;  %v872_v25 = vpop.f32.mrb[2].mxu1 }
 0x1c9   : > { %v563_v26 = vmax.f32 %v507_v22, 0.0  ;;  %v510_v27 = vadd.f32 %v872_v25, %v1035_v20  ;;  %v501_v28 = vpop.f32.mrb[3].mxu1 }
 0x1ca   : > { %v561_v29 = vmax.f32 %v499_v24, 0.0  ;;  %v502_v30 = vadd.f32 %v1035_v20, %v501_v28 }
 0x1cb   : > { %v564_v31 = vmax.f32 %v510_v27, 0.0  ;;  %v586_v33 = vsel %vm439_vm1, %v563_v26, -inf }
 0x1cc   : > { %v562_v32 = vmax.f32 %v502_v30, 0.0  ;;  %v577_v35 = vsel %vm439_vm1, %v561_v29, -inf }
 0x1cd   : > { %v587_v34 = vsel %vm439_vm1, %v564_v31, -inf }
 0x1ce   : > { %v588_v36 = vmax.f32 %v586_v33, %v587_v34  ;;  %v578_v37 = vsel %vm439_vm1, %v562_v32, -inf  ;;  %v875_v38 = vpop.f32.mrb[4].mxu1 }
 0x1cf   : > { %v579_v39 = vmax.f32 %v577_v35, %v578_v37  ;;  %v523_v40 = vadd.f32 %v875_v38, %v1035_v20  ;;  %v514_v41 = vpop.f32.mrb[5].mxu1 }
 0x1d0   : > { %v589_v42 = vrot.slane %v588_v36, 4  ;;  %v515_v43 = vadd.f32 %v1035_v20, %v514_v41  ;;  %v876_v44 = vpop.f32.mrb[6].mxu1 }
 0x1d1   : > { %v580_v45 = vrot.slane %v579_v39, 4  ;;  %v567_v46 = vmax.f32 %v523_v40, 0.0  ;;  %v526_v47 = vadd.f32 %v876_v44, %v1035_v20  ;;  %v517_v48 = vpop.f32.mrb[7].mxu1 }
 0x1d2   : > { %v590_v49 = vmax.f32 %v588_v36, %v589_v42  ;;  %v565_v50 = vmax.f32 %v515_v43, 0.0  ;;  %v518_v51 = vadd.f32 %v1035_v20, %v517_v48 }
 0x1d3   : > { %v581_v52 = vmax.f32 %v579_v39, %v580_v45  ;;  %v568_v53 = vmax.f32 %v526_v47, 0.0  ;;  %v604_v57 = vsel %vm439_vm1, %v567_v46, -inf }
 0x1d4   : > { %v591_v54 = vrot.slane %v590_v49, 2  ;;  %v566_v55 = vmax.f32 %v518_v51, 0.0  ;;  %v595_v60 = vsel %vm439_vm1, %v565_v50, -inf }
 0x1d5   : > { %v582_v56 = vrot.slane %v581_v52, 2  ;;  %v605_v58 = vsel %vm439_vm1, %v568_v53, -inf }
 0x1d6   : > { %v592_v59 = vmax.f32 %v590_v49, %v591_v54  ;;  %v606_v61 = vmax.f32 %v604_v57, %v605_v58  ;;  %v596_v62 = vsel %vm439_vm1, %v566_v55, -inf  ;;  %v879_v63 = vpop.f32.mrb[8].mxu1 }
 0x1d7   : > { %v583_v0 = vmax.f32 %v581_v52, %v582_v56  ;;  %v597_v1 = vmax.f32 %v595_v60, %v596_v62  ;;  %v539_v2 = vadd.f32 %v879_v63, %v1035_v20  ;;  %v530_v3 = vpop.f32.mrb[9].mxu1 }
 0x1d8   : > { %v593_v4 = vrot.slane %v592_v59, 1  ;;  %v607_v5 = vrot.slane %v606_v61, 4  ;;  %v531_v6 = vadd.f32 %v1035_v20, %v530_v3  ;;  %v880_v7 = vpop.f32.mrb[10].mxu1 }
 0x1d9   : > { %v584_v8 = vrot.slane %v583_v0, 1  ;;  %v598_v9 = vrot.slane %v597_v1, 4  ;;  %v571_v10 = vmax.f32 %v539_v2, 0.0  ;;  %v542_v11 = vadd.f32 %v880_v7, %v1035_v20  ;;  %v533_v12 = vpop.f32.mrb[11].mxu1 }
 0x1da   : > { %v594_v13 = vmax.f32 %v592_v59, %v593_v4  ;;  %v608_v14 = vmax.f32 %v606_v61, %v607_v5  ;;  %v569_v15 = vmax.f32 %v531_v6, 0.0  ;;  %v534_v16 = vadd.f32 %v1035_v20, %v533_v12 }
 0x1db   : > { %v585_v17 = vmax.f32 %v583_v0, %v584_v8  ;;  %v599_v18 = vmax.f32 %v597_v1, %v598_v9  ;;  %v572_v19 = vmax.f32 %v542_v11, 0.0  ;;  %v622_v25 = vsel %vm439_vm1, %v571_v10, -inf }
 0x1dc   : > { %v609_v21 = vrot.slane %v608_v14, 2  ;;  %v570_v22 = vmax.f32 %v534_v16, 0.0  ;;  %v613_v28 = vsel %vm439_vm1, %v569_v15, -inf }
 0x1dd   : > { %v658_v23 = vsel %vm657_vm2, %v594_v13, %v585_v17  ;;  %v600_v24 = vrot.slane %v599_v18, 2  ;;  %v623_v26 = vsel %vm439_vm1, %v572_v19, -inf }
 0x1de   : > { %v610_v27 = vmax.f32 %v608_v14, %v609_v21  ;;  %v624_v29 = vmax.f32 %v622_v25, %v623_v26  ;;  %v614_v30 = vsel %vm439_vm1, %v570_v22, -inf  ;;  %v883_v31 = vpop.f32.mrb[12].mxu1 }
 0x1df   : > { %v601_v32 = vmax.f32 %v599_v18, %v600_v24  ;;  %v615_v33 = vmax.f32 %v613_v28, %v614_v30  ;;  %v555_v34 = vadd.f32 %v883_v31, %v1035_v20  ;;  %v546_v35 = vpop.f32.mrb[13].mxu1 }
 0x1e0   : > { %v611_v36 = vrot.slane %v610_v27, 1  ;;  %v625_v37 = vrot.slane %v624_v29, 4  ;;  %v547_v38 = vadd.f32 %v1035_v20, %v546_v35  ;;  %v884_v39 = vpop.f32.mrb[14].mxu1 }
 0x1e1   : > { %v602_v40 = vrot.slane %v601_v32, 1  ;;  %v616_v41 = vrot.slane %v615_v33, 4  ;;  %v575_v42 = vmax.f32 %v555_v34, 0.0  ;;  %v558_v43 = vadd.f32 %v884_v39, %v1035_v20  ;;  %v549_v44 = vpop.f32.mrb[15].mxu1 }
 0x1e2   : > { %v626_v45 = vmax.f32 %v624_v29, %v625_v37  ;;  %v573_v46 = vmax.f32 %v547_v38, 0.0  ;;  %v550_v47 = vadd.f32 %v1035_v20, %v549_v44  ;;  %v612_v51 = vmax.f32 %v610_v27, %v611_v36 }
 0x1e3   : > { %v603_v48 = vmax.f32 %v601_v32, %v602_v40  ;;  %v617_v49 = vmax.f32 %v615_v33, %v616_v41  ;;  %v576_v50 = vmax.f32 %v558_v43, 0.0  ;;  %v640_v53 = vsel %vm439_vm1, %v575_v42, -inf }
 0x1e4   : > { %v627_v52 = vrot.slane %v626_v45, 2  ;;  %v574_v54 = vmax.f32 %v550_v47, 0.0  ;;  %v631_v57 = vsel %vm439_vm1, %v573_v46, -inf }
 0x1e5   : > { %v660_v55 = vsel %vm659_vm3, %v603_v48, %v658_v23  ;;  %v618_v56 = vrot.slane %v617_v49, 2  ;;  %v641_v58 = vsel %vm439_vm1, %v576_v50, -inf }
 0x1e6   : > { %v628_v59 = vmax.f32 %v626_v45, %v627_v52  ;;  %v662_v60 = vsel %vm661_vm4, %v612_v51, %v660_v55  ;;  %v642_v61 = vmax.f32 %v640_v53, %v641_v58  ;;  %v632_v20 = vsel %vm439_vm1, %v574_v54, -inf }
 0x1e7   : > { %v619_v62 = vmax.f32 %v617_v49, %v618_v56  ;;  %v633_v63 = vmax.f32 %v631_v57, %v632_v20 }
 0x1e8   : > { %v629_v0 = vrot.slane %v628_v59, 1  ;;  %v643_v1 = vrot.slane %v642_v61, 4 }
 0x1e9   : > { %v620_v2 = vrot.slane %v619_v62, 1  ;;  %v634_v3 = vrot.slane %v633_v63, 4 }
 0x1ea   : > { %v644_v4 = vmax.f32 %v642_v61, %v643_v1  ;;  %v630_v7 = vmax.f32 %v628_v59, %v629_v0 }
 0x1eb   : > { %v621_v5 = vmax.f32 %v619_v62, %v620_v2  ;;  %v635_v6 = vmax.f32 %v633_v63, %v634_v3 }
 0x1ec   : > { %v645_v8 = vrot.slane %v644_v4, 2 }
 0x1ed   : > { %v664_v9 = vsel %vm663_vm5, %v621_v5, %v662_v60  ;;  %v636_v10 = vrot.slane %v635_v6, 2 }
 0x1ee   : > { %v646_v11 = vmax.f32 %v644_v4, %v645_v8  ;;  %v666_v12 = vsel %vm665_vm6, %v630_v7, %v664_v9 }
 0x1ef   : > { %v637_v13 = vmax.f32 %v635_v6, %v636_v10 }
 0x1f0   : > { %v647_v14 = vrot.slane %v646_v11, 1 }
 0x1f1   : > { %v638_v15 = vrot.slane %v637_v13, 1 }
 0x1f2   : > { %v648_v17 = vmax.f32 %v646_v11, %v647_v14 }
 0x1f3   : > { %v639_v16 = vmax.f32 %v637_v13, %v638_v15 }
 0x1f5   : > { %v668_v18 = vsel %vm667_vm7, %v639_v16, %v666_v12 }
 0x1f6   : > { %v670_v19 = vsel %vm669_vm8, %v648_v17, %v668_v18 }
 0x1f7   : > { %672 = vst.msk [vmem:[#allocation2] sm:$0xff] %vm439_vm1, %v670_v19 }
 0x1fe   : > { %v673_v21 = vld [vmem:[#allocation2] sm:$0xff] }
 0x1ff   : > { %674 = vxpose.xlu0.b32.start.end [1/1] (short) (narrow) %v673_v21, 32 }
 0x27f   : > { %v690_v22 = vpop.trf.xlu0 }
 0x280   : > { %707 = vst.msk [vmem:[%s233_s10] sm:$0xff] %vm706_vm9, %v690_v22 }
 0x283   : > { %v691_v23 = vpop.trf.xlu0 }
 0x284   : > { %708 = vst.msk [vmem:[%s233_s10 + $0x8] sm:$0xff] %vm706_vm9, %v691_v23 }
 0x287   : > { %v692_v24 = vpop.trf.xlu0 }
 0x288   : > { %709 = vst.msk [vmem:[%s233_s10 + $0x10] sm:$0xff] %vm706_vm9, %v692_v24 }
 0x28b   : > { %v693_v25 = vpop.trf.xlu0 }
 0x28c   : > { %710 = vst.msk [vmem:[%s233_s10 + $0x18] sm:$0xff] %vm706_vm9, %v693_v25 }
 0x28d PF: > { %s14_s17 = sadd.s32 1, %s935_s17   ;;  %s1089_s15 = smov %s931_s16 }
 0x28e   : > { %p11_p5 = scmp.ge.s32.totalorder %s14_s17, 4   ;;  %s1090_s16 = smov %s1092_s18 }
 0x290   :  { %13 = sbr.rel (!%p11_p5) target bundleno = 2 (0x2), region = 66 }

</bundles_post_ra>
